<compile_context>
chip_gen: v7x
topology: tpu7x:2x2x1
jax: 0.10.0
libtpu: 0.0.40
codegen_flags: <defaults>
</compile_context>

<pallas_src>
import functools

import jax
import jax.numpy as jnp
from jax.experimental import pallas as pl
from jax.experimental.pallas import tpu as pltpu


def _round_up(x: int, m: int) -> int:
    return ((x + m - 1) // m) * m


def mlp_kernel(
    xt_ref,          # (TB, 768)  text input tile (bf16)
    xf_ref,          # (TB, 17)   feature input tile (f32)
    w1_ref, b1_ref,  # (768, 128) bf16, (1, 128) f32
    w2_ref, b2_ref,  # (128, 64)  f32,  (1, 64)  f32
    wf_ref, bf_ref,  # (17, 32)   f32,  (1, 32)  f32
    wot_ref,         # (64, 9)    output weight, text half (f32)
    wof_ref,         # (32, 9)    output weight, feature half (f32)
    bo_ref,          # (1, 9)     f32
    out_ref,         # (TB, 9)    f32
):
    xt = xt_ref[...]
    xf = xf_ref[...]

    # text branch: Linear(768,128) -> ReLU -> Linear(128,64)
    # dominant matmul: bf16 operands, f32 accumulation on the MXU
    h1 = jnp.dot(xt, w1_ref[...], preferred_element_type=jnp.float32) + b1_ref[...]
    h1 = jnp.maximum(h1, 0.0)
    t_out = jnp.dot(h1, w2_ref[...], preferred_element_type=jnp.float32) + b2_ref[...]

    # feature branch: Linear(17,32) -> ReLU
    f_out = jnp.dot(xf, wf_ref[...], preferred_element_type=jnp.float32) + bf_ref[...]
    f_out = jnp.maximum(f_out, 0.0)

    # output layer over concat([t_out, f_out], dim=1)
    #   == t_out @ Wo[:, :64].T + f_out @ Wo[:, 64:].T + bo
    out = (
        jnp.dot(t_out, wot_ref[...], preferred_element_type=jnp.float32)
        + jnp.dot(f_out, wof_ref[...], preferred_element_type=jnp.float32)
        + bo_ref[...]
    )
    out_ref[...] = out.astype(out_ref.dtype)


@functools.partial(jax.jit, static_argnames=("tb",))
def mlp_forward(x_text, x_features, params, *, tb: int = 256):
    B, Dt = x_text.shape
    _, Df = x_features.shape

    # Batch tile: prefer `tb` (>=256 fills the v6e/v7x MXU rows), but never larger
    # than the sublane-rounded batch; pad the batch to a multiple of TB.
    TB = min(tb, _round_up(B, 8))
    Bp = _round_up(B, TB)
    if Bp != B:
        x_text = jnp.pad(x_text, ((0, Bp - B), (0, 0)))
        x_features = jnp.pad(x_features, ((0, Bp - B), (0, 0)))

    # bf16 for the dominant (TB,768) x (768,128) matmul; accumulate in f32.
    xt_bf = x_text.astype(jnp.bfloat16)
    w1_bf = params["w1"].astype(jnp.bfloat16)

    grid = (Bp // TB,)

    # Batch-tiled activations / output; weights resident via constant index maps.
    in_specs = [
        pl.BlockSpec((TB, Dt), lambda i: (i, 0)),      # x_text tile
        pl.BlockSpec((TB, Df), lambda i: (i, 0)),      # x_features tile
        pl.BlockSpec((Dt, 128), lambda i: (0, 0)),     # w1
        pl.BlockSpec((1, 128), lambda i: (0, 0)),      # b1
        pl.BlockSpec((128, 64), lambda i: (0, 0)),     # w2
        pl.BlockSpec((1, 64), lambda i: (0, 0)),       # b2
        pl.BlockSpec((Df, 32), lambda i: (0, 0)),      # wf
        pl.BlockSpec((1, 32), lambda i: (0, 0)),       # bf
        pl.BlockSpec((64, 9), lambda i: (0, 0)),       # wo (text half)
        pl.BlockSpec((32, 9), lambda i: (0, 0)),       # wo (feature half)
        pl.BlockSpec((1, 9), lambda i: (0, 0)),        # bo
    ]
    out_specs = pl.BlockSpec((TB, 9), lambda i: (i, 0))

    flops = 2 * Bp * (Dt * 128 + 128 * 64 + Df * 32 + 64 * 9 + 32 * 9)
    bytes_accessed = (
        Bp * Dt * 2 + Bp * Df * 4            # inputs (bf16 text, f32 features)
        + Dt * 128 * 2 + 128 * 64 * 4        # w1 (bf16), w2
        + Df * 32 * 4 + (64 + 32) * 9 * 4    # wf, wo halves
        + (128 + 64 + 32 + 9) * 4            # biases
        + Bp * 9 * 4                         # output
    )

    out = pl.pallas_call(
        mlp_kernel,
        out_shape=jax.ShapeDtypeStruct((Bp, 9), jnp.float32),
        grid=grid,
        in_specs=in_specs,
        out_specs=out_specs,
        compiler_params=pltpu.CompilerParams(
            dimension_semantics=("parallel",),     # v7x: shard batch tiles over 2 TCs
            vmem_limit_bytes=48 * 1024 * 1024,     # explicit, safe on 64 MiB v7x VMEM
        ),
        cost_estimate=pl.CostEstimate(
            flops=flops, transcendentals=0, bytes_accessed=bytes_accessed
        ),
    )(
        xt_bf, x_features,
        w1_bf, params["b1"],
        params["w2"], params["b2"],
        params["wf"], params["bf"],
        params["wo_t"], params["wo_f"],
        params["bo"],
    )
    return out[:B] if Bp != B else out


def init_params(key, input_text_size=768, input_features_size=17):
    """Deterministic synthetic parameters (shapes match MLPModel.__init__)."""
    ks = jax.random.split(key, 10)

    def lin(kw, kb, fan_in, fan_out):
        bound = 1.0 / jnp.sqrt(fan_in)
        w = jax.random.uniform(kw, (fan_in, fan_out), jnp.float32, -bound, bound)
        b = jax.random.uniform(kb, (1, fan_out), jnp.float32, -bound, bound)
        return w, b

    w1, b1 = lin(ks[0], ks[1], input_text_size, 128)
    w2, b2 = lin(ks[2], ks[3], 128, 64)
    wf, bf = lin(ks[4], ks[5], input_features_size, 32)
    wo, bo = lin(ks[6], ks[7], 64 + 32, 9)
    return {
        "w1": w1, "b1": b1,
        "w2": w2, "b2": b2,
        "wf": wf, "bf": bf,
        "wo_t": wo[:64, :],   # text half of the output weight
        "wo_f": wo[64:, :],   # feature half of the output weight
        "bo": bo,
    }


def mlp_reference(x_text, x_features, params):
    """Pure-JAX f32 reference of the PyTorch forward pass."""
    h = jnp.maximum(x_text @ params["w1"] + params["b1"], 0.0)
    t = h @ params["w2"] + params["b2"]
    f = jnp.maximum(x_features @ params["wf"] + params["bf"], 0.0)
    cat = jnp.concatenate([t, f], axis=1)
    wo = jnp.concatenate([params["wo_t"], params["wo_f"]], axis=0)
    return cat @ wo + params["bo"]


if __name__ == "__main__":
    key = jax.random.PRNGKey(0)
    k_in1, k_in2, k_par = jax.random.split(key, 3)

    B = 8
    x_text = jax.random.normal(k_in1, (B, 768), jnp.float32)
    x_features = jax.random.normal(k_in2, (B, 17), jnp.float32)
    params = init_params(k_par)

    out = mlp_forward(x_text, x_features, params)
    out = jax.block_until_ready(out)

    ref = mlp_reference(x_text, x_features, params)
    assert out.shape == (B, 9)
    # bf16 inputs on the 768-deep contraction (f32 accumulation): relaxed tolerance.
    assert jnp.allclose(out, ref, atol=2e-2, rtol=2e-2), float(
        jnp.max(jnp.abs(out - ref))
    )

    print("KERNEL_OK")
</pallas_src>

<mosaic_0001>
module attributes {stable_mosaic.version = 11 : i64} {
  func.func @mlp_kernel(%arg0: i32, %arg1: memref<8x768xbf16, #tpu.memory_space<vmem>>, %arg2: memref<8x17xf32, #tpu.memory_space<vmem>>, %arg3: memref<768x128xbf16, #tpu.memory_space<vmem>>, %arg4: memref<1x128xf32, #tpu.memory_space<vmem>>, %arg5: memref<128x64xf32, #tpu.memory_space<vmem>>, %arg6: memref<1x64xf32, #tpu.memory_space<vmem>>, %arg7: memref<17x32xf32, #tpu.memory_space<vmem>>, %arg8: memref<1x32xf32, #tpu.memory_space<vmem>>, %arg9: memref<64x9xf32, #tpu.memory_space<vmem>>, %arg10: memref<32x9xf32, #tpu.memory_space<vmem>>, %arg11: memref<1x9xf32, #tpu.memory_space<vmem>>, %arg12: memref<8x9xf32, #tpu.memory_space<vmem>>) attributes {dimension_semantics = [#tpu.dimension_semantics<parallel>], iteration_bounds = array<i64: 1>, scalar_prefetch = 0 : i64, scratch_operands = 0 : i64, tpu.core_type = #tpu.core_type<tc>, window_params = [{transform_indices = @transform_0, window_bounds = array<i64: 8, 768>}, {transform_indices = @transform_1, window_bounds = array<i64: 8, 17>}, {pipeline_mode = #tpu.pipeline_mode<synchronous>, transform_indices = @transform_2, window_bounds = array<i64: 768, 128>}, {pipeline_mode = #tpu.pipeline_mode<synchronous>, transform_indices = @transform_3, window_bounds = array<i64: 1, 128>}, {pipeline_mode = #tpu.pipeline_mode<synchronous>, transform_indices = @transform_4, window_bounds = array<i64: 128, 64>}, {pipeline_mode = #tpu.pipeline_mode<synchronous>, transform_indices = @transform_5, window_bounds = array<i64: 1, 64>}, {pipeline_mode = #tpu.pipeline_mode<synchronous>, transform_indices = @transform_6, window_bounds = array<i64: 17, 32>}, {pipeline_mode = #tpu.pipeline_mode<synchronous>, transform_indices = @transform_7, window_bounds = array<i64: 1, 32>}, {pipeline_mode = #tpu.pipeline_mode<synchronous>, transform_indices = @transform_8, window_bounds = array<i64: 64, 9>}, {pipeline_mode = #tpu.pipeline_mode<synchronous>, transform_indices = @transform_9, window_bounds = array<i64: 32, 9>}, {pipeline_mode = #tpu.pipeline_mode<synchronous>, transform_indices = @transform_10, window_bounds = array<i64: 1, 9>}, {transform_indices = @transform_11, window_bounds = array<i64: 8, 9>}]} {
    %c0 = arith.constant 0 : index
    %c0_0 = arith.constant 0 : index
    %0 = vector.load %arg1[%c0, %c0_0] : memref<8x768xbf16, #tpu.memory_space<vmem>>, vector<8x768xbf16>
    %c0_1 = arith.constant 0 : index
    %c0_2 = arith.constant 0 : index
    %1 = vector.load %arg2[%c0_1, %c0_2] : memref<8x17xf32, #tpu.memory_space<vmem>>, vector<8x17xf32>
    %c0_3 = arith.constant 0 : index
    %c0_4 = arith.constant 0 : index
    %2 = vector.load %arg3[%c0_3, %c0_4] : memref<768x128xbf16, #tpu.memory_space<vmem>>, vector<768x128xbf16>
    %cst = arith.constant dense<0.000000e+00> : vector<8x128xf32>
    %3 = tpu.matmul %0, %2, %cst {dimension_numbers = #tpu.dot_dimension_numbers<[1], [0], [0], [1], [0, 0, 1, 1], [], []>} : vector<8x768xbf16>, vector<768x128xbf16>, vector<8x128xf32> -> vector<8x128xf32>
    %c0_5 = arith.constant 0 : index
    %c0_6 = arith.constant 0 : index
    %4 = vector.load %arg4[%c0_5, %c0_6] : memref<1x128xf32, #tpu.memory_space<vmem>>, vector<1x128xf32>
    %5 = vector.broadcast %4 : vector<1x128xf32> to vector<8x128xf32>
    %6 = arith.addf %3, %5 : vector<8x128xf32>
    %cst_7 = arith.constant 0.000000e+00 : f32
    %7 = vector.broadcast %cst_7 : f32 to vector<8x128xf32>
    %8 = arith.maximumf %6, %7 : vector<8x128xf32>
    %c0_8 = arith.constant 0 : index
    %c0_9 = arith.constant 0 : index
    %9 = vector.load %arg5[%c0_8, %c0_9] : memref<128x64xf32, #tpu.memory_space<vmem>>, vector<128x64xf32>
    %cst_10 = arith.constant dense<0.000000e+00> : vector<8x64xf32>
    %10 = tpu.matmul %8, %9, %cst_10 {dimension_numbers = #tpu.dot_dimension_numbers<[1], [0], [0], [1], [0, 0, 1, 1], [], []>} : vector<8x128xf32>, vector<128x64xf32>, vector<8x64xf32> -> vector<8x64xf32>
    %c0_11 = arith.constant 0 : index
    %c0_12 = arith.constant 0 : index
    %11 = vector.load %arg6[%c0_11, %c0_12] : memref<1x64xf32, #tpu.memory_space<vmem>>, vector<1x64xf32>
    %12 = vector.broadcast %11 : vector<1x64xf32> to vector<8x64xf32>
    %13 = arith.addf %10, %12 : vector<8x64xf32>
    %c0_13 = arith.constant 0 : index
    %c0_14 = arith.constant 0 : index
    %14 = vector.load %arg7[%c0_13, %c0_14] : memref<17x32xf32, #tpu.memory_space<vmem>>, vector<17x32xf32>
    %cst_15 = arith.constant dense<0.000000e+00> : vector<8x32xf32>
    %15 = tpu.matmul %1, %14, %cst_15 {dimension_numbers = #tpu.dot_dimension_numbers<[1], [0], [0], [1], [0, 0, 1, 1], [], []>} : vector<8x17xf32>, vector<17x32xf32>, vector<8x32xf32> -> vector<8x32xf32>
    %c0_16 = arith.constant 0 : index
    %c0_17 = arith.constant 0 : index
    %16 = vector.load %arg8[%c0_16, %c0_17] : memref<1x32xf32, #tpu.memory_space<vmem>>, vector<1x32xf32>
    %17 = vector.broadcast %16 : vector<1x32xf32> to vector<8x32xf32>
    %18 = arith.addf %15, %17 : vector<8x32xf32>
    %cst_18 = arith.constant 0.000000e+00 : f32
    %19 = vector.broadcast %cst_18 : f32 to vector<8x32xf32>
    %20 = arith.maximumf %18, %19 : vector<8x32xf32>
    %c0_19 = arith.constant 0 : index
    %c0_20 = arith.constant 0 : index
    %21 = vector.load %arg9[%c0_19, %c0_20] : memref<64x9xf32, #tpu.memory_space<vmem>>, vector<64x9xf32>
    %cst_21 = arith.constant dense<0.000000e+00> : vector<8x9xf32>
    %22 = tpu.matmul %13, %21, %cst_21 {dimension_numbers = #tpu.dot_dimension_numbers<[1], [0], [0], [1], [0, 0, 1, 1], [], []>} : vector<8x64xf32>, vector<64x9xf32>, vector<8x9xf32> -> vector<8x9xf32>
    %c0_22 = arith.constant 0 : index
    %c0_23 = arith.constant 0 : index
    %23 = vector.load %arg10[%c0_22, %c0_23] : memref<32x9xf32, #tpu.memory_space<vmem>>, vector<32x9xf32>
    %cst_24 = arith.constant dense<0.000000e+00> : vector<8x9xf32>
    %24 = tpu.matmul %20, %23, %cst_24 {dimension_numbers = #tpu.dot_dimension_numbers<[1], [0], [0], [1], [0, 0, 1, 1], [], []>} : vector<8x32xf32>, vector<32x9xf32>, vector<8x9xf32> -> vector<8x9xf32>
    %25 = arith.addf %22, %24 : vector<8x9xf32>
    %c0_25 = arith.constant 0 : index
    %c0_26 = arith.constant 0 : index
    %26 = vector.load %arg11[%c0_25, %c0_26] : memref<1x9xf32, #tpu.memory_space<vmem>>, vector<1x9xf32>
    %27 = vector.broadcast %26 : vector<1x9xf32> to vector<8x9xf32>
    %28 = arith.addf %25, %27 : vector<8x9xf32>
    %c0_27 = arith.constant 0 : index
    %c0_28 = arith.constant 0 : index
    %29 = vector.load %arg12[%c0_27, %c0_28] : memref<8x9xf32, #tpu.memory_space<vmem>>, vector<8x9xf32>
    tpu.vector_store %arg12[%c0_27, %c0_28], %28 {strides = array<i32>} : memref<8x9xf32, #tpu.memory_space<vmem>>, vector<8x9xf32>,
    return
  }
  func.func @transform_0(%arg0: i32) -> (i32, i32) {
    %c0_i32 = arith.constant 0 : i32
    %c0_i32_0 = arith.constant 0 : i32
    return %arg0, %c0_i32 : i32, i32
  }
  func.func @transform_1(%arg0: i32) -> (i32, i32) {
    %c0_i32 = arith.constant 0 : i32
    %c0_i32_0 = arith.constant 0 : i32
    return %arg0, %c0_i32 : i32, i32
  }
  func.func @transform_2(%arg0: i32) -> (i32, i32) {
    %c0_i32 = arith.constant 0 : i32
    %c0_i32_0 = arith.constant 0 : i32
    %c0_i32_1 = arith.constant 0 : i32
    return %c0_i32, %c0_i32_0 : i32, i32
  }
  func.func @transform_3(%arg0: i32) -> (i32, i32) {
    %c0_i32 = arith.constant 0 : i32
    %c0_i32_0 = arith.constant 0 : i32
    %c0_i32_1 = arith.constant 0 : i32
    return %c0_i32, %c0_i32_0 : i32, i32
  }
  func.func @transform_4(%arg0: i32) -> (i32, i32) {
    %c0_i32 = arith.constant 0 : i32
    %c0_i32_0 = arith.constant 0 : i32
    %c0_i32_1 = arith.constant 0 : i32
    return %c0_i32, %c0_i32_0 : i32, i32
  }
  func.func @transform_5(%arg0: i32) -> (i32, i32) {
    %c0_i32 = arith.constant 0 : i32
    %c0_i32_0 = arith.constant 0 : i32
    %c0_i32_1 = arith.constant 0 : i32
    return %c0_i32, %c0_i32_0 : i32, i32
  }
  func.func @transform_6(%arg0: i32) -> (i32, i32) {
    %c0_i32 = arith.constant 0 : i32
    %c0_i32_0 = arith.constant 0 : i32
    %c0_i32_1 = arith.constant 0 : i32
    return %c0_i32, %c0_i32_0 : i32, i32
  }
  func.func @transform_7(%arg0: i32) -> (i32, i32) {
    %c0_i32 = arith.constant 0 : i32
    %c0_i32_0 = arith.constant 0 : i32
    %c0_i32_1 = arith.constant 0 : i32
    return %c0_i32, %c0_i32_0 : i32, i32
  }
  func.func @transform_8(%arg0: i32) -> (i32, i32) {
    %c0_i32 = arith.constant 0 : i32
    %c0_i32_0 = arith.constant 0 : i32
    %c0_i32_1 = arith.constant 0 : i32
    return %c0_i32, %c0_i32_0 : i32, i32
  }
  func.func @transform_9(%arg0: i32) -> (i32, i32) {
    %c0_i32 = arith.constant 0 : i32
    %c0_i32_0 = arith.constant 0 : i32
    %c0_i32_1 = arith.constant 0 : i32
    return %c0_i32, %c0_i32_0 : i32, i32
  }
  func.func @transform_10(%arg0: i32) -> (i32, i32) {
    %c0_i32 = arith.constant 0 : i32
    %c0_i32_0 = arith.constant 0 : i32
    %c0_i32_1 = arith.constant 0 : i32
    return %c0_i32, %c0_i32_0 : i32, i32
  }
  func.func @transform_11(%arg0: i32) -> (i32, i32) {
    %c0_i32 = arith.constant 0 : i32
    %c0_i32_0 = arith.constant 0 : i32
    return %arg0, %c0_i32 : i32, i32
  }
}

</mosaic_0001>

<bundles_post_ra>
// kernel: mlp_forward.1
= control target key start
LH: loop header
LB: loop body
LE: loop exit
PB: predicated region body
PF: predicated region fallthrough
CT: control target
= control target key end

     0   :  { %s1663_s0 = inlined_call_operand.vmem [shape: bf16[8,768], index: 0, kind: input, shape index: {}]   ;;  %s1664_s1 = inlined_call_operand.vmem [shape: f32[8,17], index: 1, kind: input, shape index: {}]   ;;  %s1665_s2 = inlined_call_operand.vmem [shape: bf16[768,128], index: 2, kind: input, shape index: {}]   ;;  %s1666_s3 = inlined_call_operand.vmem [shape: f32[1,128], index: 3, kind: input, shape index: {}]   ;;  %s1667_s4 = inlined_call_operand.vmem [shape: f32[128,64], index: 4, kind: input, shape index: {}]   ;;  %s1668_s5 = inlined_call_operand.vmem [shape: f32[1,64], index: 5, kind: input, shape index: {}]   ;;  %s1669_s6 = inlined_call_operand.vmem [shape: f32[17,32], index: 6, kind: input, shape index: {}]   ;;  %s1670_s7 = inlined_call_operand.vmem [shape: f32[1,32], index: 7, kind: input, shape index: {}]   ;;  %s1671_s8 = inlined_call_operand.vmem [shape: f32[64,9], index: 8, kind: input, shape index: {}]   ;;  %s1672_s9 = inlined_call_operand.vmem [shape: f32[32,9], index: 9, kind: input, shape index: {}]   ;;  %s1673_s10 = inlined_call_operand.vmem [shape: f32[1,9], index: 10, kind: input, shape index: {}]   ;;  %s1674_s11 = inlined_call_operand.hbm [shape: f32[8,9], index: 11, kind: output, shape index: {}]  }
   0x1   :  { %v1229_v0 = vld [vmem:[%s1665_s2 + $0x40] sm:$0xff]   ;;  %v1233_v4 = vld [vmem:[%s1665_s2 + $0x48] sm:$0xff]   ;;  %v1237_v8 = vld [vmem:[%s1665_s2 + $0x50] sm:$0xff]  }
   0x2   :  { %v1230_v1 = vld [vmem:[%s1665_s2] sm:$0xff]   ;;  %1005 = vmatprep.subr.bf16.mxu0 %v1229_v0  ;;  %v1234_v5 = vld [vmem:[%s1665_s2 + $0x8] sm:$0xff]   ;;  %v1238_v9 = vld [vmem:[%s1665_s2 + $0x10] sm:$0xff]  }
   0x3   :  { %v1231_v2 = vld [vmem:[%s1665_s2 + $0xc0] sm:$0xff]   ;;  %1006 = vmatpush3.bf16.msra.mxu0 %v1230_v1  ;;  %v1235_v6 = vld [vmem:[%s1665_s2 + $0xc8] sm:$0xff]   ;;  %v1239_v10 = vld [vmem:[%s1665_s2 + $0xd0] sm:$0xff]  }
   0x4   :  { %v1232_v3 = vld [vmem:[%s1665_s2 + $0x80] sm:$0xff]   ;;  %1027 = vmatprep.subr.bf16.mxu1 %v1231_v2  ;;  %1007 = vmatprep.subr.bf16.mxu0 %v1233_v4  ;;  %v1236_v7 = vld [vmem:[%s1665_s2 + $0x88] sm:$0xff]   ;;  %v1240_v11 = vld [vmem:[%s1665_s2 + $0x90] sm:$0xff]  }
   0x5   :  { %1028 = vmatpush3.bf16.msra.mxu1 %v1232_v3  ;;  %v1241_v12 = vld [vmem:[%s1665_s2 + $0x58] sm:$0xff]   ;;  %v1245_v16 = vld [vmem:[%s1665_s2 + $0x60] sm:$0xff]   ;;  %v1249_v20 = vld [vmem:[%s1665_s2 + $0x68] sm:$0xff]  }
   0x6   :  { %1029 = vmatprep.subr.bf16.mxu1 %v1235_v6  ;;  %v1242_v13 = vld [vmem:[%s1665_s2 + $0x18] sm:$0xff]   ;;  %v1246_v17 = vld [vmem:[%s1665_s2 + $0x20] sm:$0xff]   ;;  %v1250_v21 = vld [vmem:[%s1665_s2 + $0x28] sm:$0xff]  }
   0x7   :  { %1008 = vmatpush3.bf16.msra.mxu0 %v1234_v5  ;;  %v1243_v14 = vld [vmem:[%s1665_s2 + $0xd8] sm:$0xff]   ;;  %v1247_v18 = vld [vmem:[%s1665_s2 + $0xe0] sm:$0xff]   ;;  %v1251_v22 = vld [vmem:[%s1665_s2 + $0xe8] sm:$0xff]  }
   0x8   :  { %1009 = vmatprep.subr.bf16.mxu0 %v1237_v8  ;;  %v1244_v15 = vld [vmem:[%s1665_s2 + $0x98] sm:$0xff]   ;;  %v1248_v19 = vld [vmem:[%s1665_s2 + $0xa0] sm:$0xff]   ;;  %v1252_v23 = vld [vmem:[%s1665_s2 + $0xa8] sm:$0xff]  }
   0x9   :  { %1030 = vmatpush3.bf16.msra.mxu1 %v1236_v7  ;;  %v1253_v24 = vld [vmem:[%s1665_s2 + $0x70] sm:$0xff]   ;;  %v1257_v28 = vld [vmem:[%s1665_s2 + $0x78] sm:$0xff]   ;;  %v40_v31 = vld [vmem:[%s1663_s0] sm:$0xff] }
   0xa   :  { %1031 = vmatprep.subr.bf16.mxu1 %v1239_v10  ;;  %v1254_v25 = vld [vmem:[%s1665_s2 + $0x30] sm:$0xff]   ;;  %v1258_v29 = vld [vmem:[%s1665_s2 + $0x38] sm:$0xff]   ;;  %v944_v32 = vcombine.low %v40_v31, %v40_v31  ;;  %v945_v33 = vcombine.high %v40_v31, %v40_v31  ;;  %v1263_v35 = vld [vmem:[%s1665_s2 + $0x140] sm:$0xff]  }
   0xb   :  { %1010 = vmatpush3.bf16.msra.mxu0 %v1238_v9  ;;  %v1255_v26 = vld [vmem:[%s1665_s2 + $0xf0] sm:$0xff]   ;;  %v1259_v30 = vld [vmem:[%s1665_s2 + $0xf8] sm:$0xff]   ;;  %v41_v36 = vld [vmem:[%s1663_s0 + $0x8] sm:$0xff] }
   0xc   :  { %1011 = vmatprep.subr.bf16.mxu0 %v1241_v12  ;;  %v1256_v27 = vld [vmem:[%s1665_s2 + $0xb0] sm:$0xff]   ;;  %v1262_v34 = vld [vmem:[%s1665_s2 + $0xb8] sm:$0xff]   ;;  %488 = vmatprep.mubr.bf16.mxu0 %v945_v33  ;;  %v946_v37 = vcombine.low %v41_v36, %v41_v36  ;;  %v947_v38 = vcombine.high %v41_v36, %v41_v36  ;;  %v1266_v39 = vld [vmem:[%s1665_s2 + $0x100] sm:$0xff]  }
   0xd   :  { %1032 = vmatpush3.bf16.msra.mxu1 %v1240_v11  ;;  %v1267_v40 = vld [vmem:[%s1665_s2 + $0x148] sm:$0xff]   ;;  %v1269_v42 = vld [vmem:[%s1665_s2 + $0x150] sm:$0xff]   ;;  %v1271_v44 = vld [vmem:[%s1665_s2 + $0x158] sm:$0xff]  }
   0xe   :  { %1033 = vmatprep.subr.bf16.mxu1 %v1243_v14  ;;  %528 = vmatprep.mubr.bf16.mxu1 %v947_v38  ;;  %v1268_v41 = vld [vmem:[%s1665_s2 + $0x108] sm:$0xff]   ;;  %v1270_v43 = vld [vmem:[%s1665_s2 + $0x110] sm:$0xff]   ;;  %v1272_v45 = vld [vmem:[%s1665_s2 + $0x118] sm:$0xff]  }
   0xf   :  { %1012 = vmatpush3.bf16.msra.mxu0 %v1242_v13  ;;  %v1273_v46 = vld [vmem:[%s1665_s2 + $0x160] sm:$0xff]   ;;  %v42_v48 = vld [vmem:[%s1663_s0 + $0x10] sm:$0xff]  ;;  %v1275_v49 = vld [vmem:[%s1665_s2 + $0x168] sm:$0xff]  }
  0x10   :  { %1013 = vmatprep.subr.bf16.mxu0 %v1245_v16  ;;  %v1274_v47 = vld [vmem:[%s1665_s2 + $0x120] sm:$0xff]   ;;  %v949_v50 = vcombine.high %v42_v48, %v42_v48 }
  0x11   :  { %1034 = vmatpush3.bf16.msra.mxu1 %v1244_v15 }
  0x12   :  { %1035 = vmatprep.subr.bf16.mxu1 %v1247_v18 }
  0x13   :  { %1014 = vmatpush3.bf16.msra.mxu0 %v1246_v17 }
  0x14   :  { %1015 = vmatprep.subr.bf16.mxu0 %v1249_v20 }
  0x15   :  { %1036 = vmatpush3.bf16.msra.mxu1 %v1248_v19 }
  0x16   :  { %1037 = vmatprep.subr.bf16.mxu1 %v1251_v22 }
  0x17   :  { %1016 = vmatpush3.bf16.msra.mxu0 %v1250_v21 }
  0x18   :  { %1017 = vmatprep.subr.bf16.mxu0 %v1253_v24 }
  0x19   :  { %1038 = vmatpush3.bf16.msra.mxu1 %v1252_v23 }
  0x1a   :  { %1039 = vmatprep.subr.bf16.mxu1 %v1255_v26 }
  0x1b   :  { %1018 = vmatpush3.bf16.msra.mxu0 %v1254_v25 }
  0x1c   :  { %1019 = vmatprep.subr.bf16.mxu0 %v1257_v28 }
  0x1d   :  { %1040 = vmatpush3.bf16.msra.mxu1 %v1256_v27 }
  0x1e   :  { %1041 = vmatprep.subr.bf16.mxu1 %v1259_v30 }
  0x1f   :  { %1020 = vmatpush3.bf16.msra.mxu0 %v1258_v29 }
  0x20   :  { %1049 = vmatprep.subr.bf16.mxu0 %v1263_v35 }
  0x21   :  { %1042 = vmatpush3.bf16.msra.mxu1 %v1262_v34 }
  0x22   :  { %489 = vmatmul.mubr.bf16.vlgmr.msra.gmra.mrb[0].mxu0 %v944_v32 }
  0x23   :  { %1050 = vmatpush3.bf16.msra.mxu0 %v1266_v39 }
  0x24   :  { %529 = vmatmul.mubr.bf16.vlgmr.msra.gmra.mrb[0].mxu1 %v946_v37  ;;  %1051 = vmatprep.subr.bf16.mxu0 %v1267_v40 }
  0x27   :  { %1052 = vmatpush3.bf16.msra.mxu0 %v1268_v41 }
  0x28   :  { %1053 = vmatprep.subr.bf16.mxu0 %v1269_v42 }
  0x2b   :  { %1054 = vmatpush3.bf16.msra.mxu0 %v1270_v43 }
  0x2c   :  { %1055 = vmatprep.subr.bf16.mxu0 %v1271_v44 }
  0x2f   :  { %1056 = vmatpush3.bf16.msra.mxu0 %v1272_v45 }
  0x30   :  { %1057 = vmatprep.subr.bf16.mxu0 %v1273_v46 }
  0x31   :  { %16 = vsyncpa [#allocation3], 0  ;;  %568 = vmatprep.mubr.bf16.mxu0 %v949_v50  ;;  %v1276_v51 = vld [vmem:[%s1665_s2 + $0x128] sm:$0xff]   ;;  %v1277_v52 = vld [vmem:[%s1665_s2 + $0x170] sm:$0xff]   ;;  %v948_v56 = vcombine.low %v42_v48, %v42_v48  ;;  %v1307_v60 = vmov 0.0|0.0   ;;  %v1308_v20 = vmov 0.0  }
  0x32   :  { %v1278_v53 = vld [vmem:[%s1665_s2 + $0x130] sm:$0xff]   ;;  %v1279_v54 = vld [vmem:[%s1665_s2 + $0x178] sm:$0xff]   ;;  %v577_v57 = vld [vmem:[%s1667_s4] sm:$0xff]  ;;  %1180 = vmatprep.subr.bf16.mxu1 %v1307_v60  ;;  %vm684_vm0 = vcmask 1040384   ;;  %vm1309_vm1 = vmmov 0   ;;  %vm680_vm2 = vcmask 138240  }
  0x33   :  { %1058 = vmatpush3.bf16.msra.mxu0 %v1274_v47  ;;  %v1280_v55 = vld [vmem:[%s1665_s2 + $0x138] sm:$0xff]   ;;  %v578_v58 = vld [vmem:[%s1667_s4 + $0x8] sm:$0xff]  ;;  %v579_v59 = vld [vmem:[%s1667_s4 + $0x10] sm:$0xff]  ;;  %1138 = vmatprep.mubr.msk.f32.mxu1 %vm1309_vm1, %v1308_v20  ;;  %vm771_vm3 = vcmask 261120   ;;  %vm845_vm4 = vcmask 523264   ;;  %vm927_vm5 = vcmask 72704  }
  0x34   :  { %1059 = vmatprep.subr.bf16.mxu0 %v1275_v49  ;;  %v1181_v61 = vpack.c.bf16 %v578_v58, %v577_v57  ;;  %v580_v62 = vld [vmem:[%s1667_s4 + $0x18] sm:$0xff]  ;;  %v581_v0 = vld [vmem:[%s1667_s4 + $0x20] sm:$0xff]  ;;  %v582_v1 = vld [vmem:[%s1667_s4 + $0x28] sm:$0xff] }
  0x35   :  { %v1184_v63 = vpack.c.bf16 %v580_v62, %v579_v59  ;;  %v670_v2 = vld [vmem:[%s1669_s6] sm:$0xff]  ;;  %v671_v3 = vld [vmem:[%s1669_s6 + $0x8] sm:$0xff]  ;;  %v1187_v5 = vpack.c.bf16 %v582_v1, %v581_v0  ;;  %v583_v6 = vld [vmem:[%s1667_s4 + $0x30] sm:$0xff] }
  0x36   :  { %1182 = vmatpush3.bf16.msra.mxu1 %v1181_v61  ;;  %v1205_v4 = vpack.c.bf16 %v671_v3, %v670_v2  ;;  %v584_v7 = vld [vmem:[%s1667_s4 + $0x38] sm:$0xff]  ;;  %v585_v9 = vld [vmem:[%s1667_s4 + $0x40] sm:$0xff]  ;;  %v586_v10 = vld [vmem:[%s1667_s4 + $0x48] sm:$0xff] }
  0x37   :  { %1060 = vmatpush3.bf16.msra.mxu0 %v1276_v51  ;;  %1183 = vmatprep.subr.bf16.mxu1 %v1307_v60  ;;  %v1190_v8 = vpack.c.bf16 %v584_v7, %v583_v6  ;;  %v1193_v11 = vpack.c.bf16 %v586_v10, %v585_v9  ;;  %v587_v12 = vld [vmem:[%s1667_s4 + $0x50] sm:$0xff]  ;;  %v588_v13 = vld [vmem:[%s1667_s4 + $0x58] sm:$0xff]  ;;  %v589_v15 = vld [vmem:[%s1667_s4 + $0x60] sm:$0xff] }
  0x38   :  { %1061 = vmatprep.subr.bf16.mxu0 %v1277_v52  ;;  %v1196_v14 = vpack.c.bf16 %v588_v13, %v587_v12  ;;  %v590_v16 = vld [vmem:[%s1667_s4 + $0x68] sm:$0xff]  ;;  %v591_v18 = vld [vmem:[%s1667_s4 + $0x70] sm:$0xff]  ;;  %v592_v19 = vld [vmem:[%s1667_s4 + $0x78] sm:$0xff] }
  0x39   :  { %v1199_v17 = vpack.c.bf16 %v590_v16, %v589_v15  ;;  %v672_v21 = vld [vmem:[%s1669_s6 + $0x10] sm:$0x1]  ;;  %v1202_v22 = vpack.c.bf16 %v592_v19, %v591_v18  ;;  %v43_v23 = vld [vmem:[%s1664_s1] sm:$0xff]  ;;  %v768_v25 = vld [vmem:[%s1672_s9 + $0x8] sm:$0xff]  ;;  %s1310_s1 = smov [#allocation2]  }
  0x3a   :  { %1185 = vmatpush3.bf16.msra.mxu1 %v1184_v63  ;;  %v767_v24 = vld [vmem:[%s1672_s9] sm:$0xff]  ;;  %v769_v27 = vld [vmem:[%s1672_s9 + $0x10] sm:$0xff]  ;;  %v770_v28 = vld [vmem:[%s1672_s9 + $0x18] sm:$0xff]  ;;  %s935_s23 = sshll.u32 %s1310_s1, 4  ;;  %s936_s23 = int_to_ptr.vmem [resolvable:$true] %s935_s23 }
  0x3b   :  { %1062 = vmatpush3.bf16.msra.mxu0 %v1278_v53  ;;  %1186 = vmatprep.subr.bf16.mxu1 %v1307_v60  ;;  %v1208_v26 = vpack.c.bf16 %v768_v25, %v767_v24  ;;  %v1211_v29 = vpack.c.bf16 %v770_v28, %v769_v27  ;;  %v943_v31 = vld [vmem:[%s1666_s3] ss:$0 sm:$0xff]  ;;  %v760_v48 = vld [vmem:[%s1671_s8 + $0x8] sm:$0xff]  ;;  %v761_v53 = vld [vmem:[%s1671_s8 + $0x10] sm:$0xff]  ;;  %p1288_p1 = scmp.lt.s32.totalorder %s936_s23, %s936_s23 }
  0x3c   :  { %1063 = vmatprep.subr.bf16.mxu0 %v1279_v54  ;;  %v759_v47 = vld [vmem:[%s1671_s8] sm:$0xff]  ;;  %v762_v54 = vld [vmem:[%s1671_s8 + $0x18] sm:$0xff]  ;;  %v764_v57 = vld [vmem:[%s1671_s8 + $0x28] sm:$0xff] }
  0x3d   :  { %v1214_v51 = vpack.c.bf16 %v760_v48, %v759_v47  ;;  %v999_v59 = vld [vmem:[%s1670_s7] ss:$0 sm:$0xff]  ;;  %v765_v62 = vld [vmem:[%s1671_s8 + $0x30] sm:$0xff]  ;;  %v766_v63 = vld [vmem:[%s1671_s8 + $0x38] sm:$0xff] }
  0x3e   :  { %1188 = vmatpush3.bf16.msra.mxu1 %v1187_v5  ;;  %v1223_v2 = vpack.c.bf16 %v766_v63, %v765_v62  ;;  %v1004_v10 = vld [vmem:[%s1673_s10] ss:$0 sm:$0xff] }
  0x3f   :  { %1064 = vmatpush3.bf16.msra.mxu0 %v1280_v55  ;;  %1189 = vmatprep.subr.bf16.mxu1 %v1307_v60  ;;  %v1217_v55 = vpack.c.bf16 %v762_v54, %v761_v53 }
  0x40   :  { %1204 = vmatprep.subr.bf16.mxu0 %v1307_v60 }
  0x42   :  { %569 = vmatmul.mubr.bf16.vlgmr.msra.gmra.mrb[4].mxu0 %v948_v56  ;;  %1191 = vmatpush3.bf16.msra.mxu1 %v1190_v8  ;;  %v763_v56 = vld [vmem:[%s1671_s8 + $0x20] sm:$0xff] }
  0x43   :  { %1206 = vmatpush3.bf16.msra.mxu0 %v1205_v4  ;;  %1192 = vmatprep.subr.bf16.mxu1 %v1307_v60  ;;  %v1220_v58 = vpack.c.bf16 %v764_v57, %v763_v56 }
  0x44   :  { %1145 = vmatprep.subr.mxu0 %v1308_v20  ;;  %1147 = vmatprep.mubr.msk.f32.mxu0 %vm1309_vm1, %v1308_v20 }
  0x46   :  { %1194 = vmatpush3.bf16.msra.mxu1 %v1193_v11 }
  0x47   :  { %1195 = vmatprep.subr.bf16.mxu1 %v1307_v60  ;;  %1146 = vmatpush3.msk.msra.mxu0 %vm684_vm0, %v672_v21 }
  0x48   :  { %1207 = vmatprep.subr.bf16.mxu0 %v1307_v60 }
  0x4a   :  { %1197 = vmatpush3.bf16.msra.mxu1 %v1196_v14  ;;  %1148 = vmatmul.mubr.msk.f32.vlgmr.msra.gmra.mrb[8].mxu0 %vm680_vm2, %v43_v23 }
  0x4b   :  { %1198 = vmatprep.subr.bf16.mxu1 %v1307_v60  ;;  %1158 = vmatprep.mubr.msk.f32.mxu0 %vm1309_vm1, %v1308_v20 }
  0x4c   :  { %1209 = vmatpush3.bf16.msra.mxu0 %v1208_v26 }
  0x4d   :  { %1210 = vmatprep.subr.bf16.mxu0 %v1307_v60 }
  0x4e   :  { %1200 = vmatpush3.bf16.msra.mxu1 %v1199_v17 }
  0x4f   :  { %1201 = vmatprep.subr.bf16.mxu1 %v1307_v60 }
  0x50   :  { %1212 = vmatpush3.bf16.msra.mxu0 %v1211_v29 }
  0x52   :  { %1203 = vmatpush3.bf16.msra.mxu1 %v1202_v22 }
  0x53   :  { %1213 = vmatprep.subr.bf16.mxu1 %v1307_v60 }
  0xf5   :  { %v1021_v30 = vpop.f32.mrb[0].mxu0 }
  0xf6   :  { %v1022_v32 = vpop.f32.mrb[1].mxu0 }
  0xf7   :  { %v1023_v33 = vadd.f32 %v1022_v32, %v1021_v30  ;;  %v1024_v34 = vpop.f32.mrb[2].mxu0  ;;  %v1043_v35 = vpop.f32.mrb[0].mxu1 }
  0xf8   :  { %v1025_v36 = vpop.f32.mrb[3].mxu0  ;;  %v1044_v37 = vpop.f32.mrb[1].mxu1 }
  0xf9   :  { %v491_v38 = vadd.f32 %v1023_v33, %v943_v31  ;;  %v1045_v39 = vadd.f32 %v1044_v37, %v1043_v35  ;;  %v1046_v40 = vpop.f32.mrb[2].mxu1 }
  0xfa   :  { %v1047_v41 = vpop.f32.mrb[3].mxu1 }
  0xfb   :  { %v531_v42 = vadd.f32 %v1045_v39, %v491_v38 }
 0x115   :  { %v1065_v43 = vpop.f32.mrb[4].mxu0 }
 0x116   :  { %v1066_v44 = vpop.f32.mrb[5].mxu0 }
 0x117   :  { %v1067_v45 = vadd.f32 %v1066_v44, %v1065_v43  ;;  %v1068_v46 = vpop.f32.mrb[6].mxu0 }
 0x118   :  { %v1069_v49 = vpop.f32.mrb[7].mxu0 }
 0x119   :  { %v571_v50 = vadd.f32 %v1067_v45, %v531_v42 }
 0x11b   :  { %v576_v52 = vmax.f32 %v571_v50, 0.0 }
 0x11d   :  { %1139 = vmatmul.mubr.f32.vlgmr.msra.gmra.mrb[4].mxu1 %v576_v52  ;;  %v754_v61 = vpop.f32.mrb[8].mxu0 }
 0x11e   :  { %1215 = vmatpush3.bf16.msra.mxu1 %v1214_v51  ;;  %1177 = vmatprep.mubr.msk.f32.mxu1 %vm1309_vm1, %v1308_v20  ;;  %v755_v0 = vadd.f32 %v999_v59, %v754_v61  ;;  %v1149_v1 = vpop.f32.mrb[9].mxu0 }
 0x11f   :  { %1216 = vmatprep.subr.bf16.mxu1 %v1307_v60 }
 0x120   :  { %v758_v3 = vmax.f32 %v755_v0, 0.0 }
 0x122   :  { %1218 = vmatpush3.bf16.msra.mxu1 %v1217_v55  ;;  %1159 = vmatmul.mubr.msk.f32.vlgmr.msra.gmra.mrb[10].mxu0 %vm771_vm3, %v758_v3 }
 0x123   :  { %1219 = vmatprep.subr.bf16.mxu1 %v1307_v60 }
 0x126   :  { %1221 = vmatpush3.bf16.msra.mxu1 %v1220_v58 }
 0x127   :  { %1222 = vmatprep.subr.bf16.mxu1 %v1307_v60  ;;  %v998_v60 = vld [vmem:[%s1668_s5] ss:$0 sm:$0xff]  ;;  %s1283_s5 = scalar_lea.vmem %s936_s23, 128 }
 0x128   :  { %p1284_p0 = scmp.ne.s32.totalorder %s936_s23, %s1283_s5  ;;  %p1289_p2 = scmp.lt.s32.totalorder %s1283_s5, %s1283_s5 }
 0x12a   :  { %1224 = vmatpush3.bf16.msra.mxu1 %v1223_v2  ;;  %p1290_p3 = por %p1289_p2, %p1288_p1 }
 0x12c   :  { %p1291_p4 = pnand %p1290_p3, %p1284_p0 }
 0x1f0   :  { %v666_v4 = vpop.f32.mrb[4].mxu1 }
 0x1f1   :  { %v667_v5 = vadd.f32 %v998_v60, %v666_v4  ;;  %v1140_v6 = vpop.f32.mrb[5].mxu1 }
 0x1f3   :  { %1178 = vmatmul.mubr.msk.f32.vlgmr.msra.gmra.mrb[6].mxu1 %vm845_vm4, %v667_v5 }
 0x1f5   :  { %v841_v7 = vpop.f32.mrb[10].mxu0 }
 0x1f6   :  { %v1160_v8 = vpop.f32.mrb[11].mxu0 }
 0x2c6   :  { %v915_v9 = vpop.f32.mrb[6].mxu1 }
 0x2c7   :  { %v916_v11 = vadd.f32 %v915_v9, %v841_v7  ;;  %v1179_v12 = vpop.f32.mrb[7].mxu1 }
 0x2c9   :  { %v926_v13 = vadd.f32 %v1004_v10, %v916_v11 }
 0x2cb   :  { %928 = vst.msk [vmem:[#allocation2] sm:$0xff] %vm927_vm5, %v926_v13 }
 0x2cc   :  { %1294 = shalt.err (!%p1291_p4)
}
 0x2cd   :  { %s1295_s26 = scalar_lea.hbm %s1674_s11, 128 }
 0x2ce   :  { %p1296_p5 = scmp.ne.s32.totalorder %s1674_s11, %s1295_s26  ;;  %p1299_p6 = scmp.lt.u32.totalorder %s1295_s26, %s1674_s11 }
 0x2d0   :  { %p1301_p7 = pnand %p1299_p6, %p1296_p5 }
 0x2d2   :  { %1304 = shalt.err (!%p1301_p7)
}
 0x2d3   :  { %938 = dma.vmem_to_hbm [thread:$0]  %s936_s23, 128, %s1674_s11, [#allocation3]  }
 0x2d4   :  { %1305 = dma.done.wait [#allocation3], 128  }
 0x2d5   :  { %1306 = vsyncadd [#allocation3], 4294967168 }
 0x2d6   :  { %942 = vsyncpa [#allocation3], 1 }

</bundles_post_ra>
